<compile_context>
chip_gen: v6e
topology: v6e:2x2x1
jax: 0.10.0
libtpu: 0.0.40
codegen_flags: <defaults>
</compile_context>

<pallas_src>
import jax
import jax.numpy as jnp
from jax.experimental import pallas as pl
from jax.experimental.pallas import tpu as pltpu


def memory_logits_kernel(x_ref, w_ref, o_ref):
    # x_ref: (B, F)  bf16, whole batch
    # w_ref: (F, TC) bf16, class slab of the (pre-transposed) memory bank
    # o_ref: (B, TC) f32 logits slab
    o_ref[...] = jnp.dot(
        x_ref[...], w_ref[...], preferred_element_type=jnp.float32
    ).astype(o_ref.dtype)


def _round_up(x, m):
    return (x + m - 1) // m * m


def _pick_class_tile(c_pad, b, f, w_bytes, x_bytes, budget):
    """Largest class tile whose double-buffered tiles fit `budget` bytes."""
    fitting = []
    for tc in (2048, 1024, 512, 256, 128):
        if c_pad % tc:
            continue
        need = 2 * b * f * x_bytes + 2 * f * tc * w_bytes + 2 * b * tc * 4
        if need <= budget:
            fitting.append(tc)
    if not fitting:
        return 128
    # Prefer >= 2 grid steps so v7x's two TensorCores both get work.
    multi = [tc for tc in fitting if c_pad // tc >= 2]
    return max(multi) if multi else max(fitting)


def memory_forward(inputs, mem, targets=None, epoch=None, *,
                   compute_dtype=jnp.bfloat16):
    """Pallas equivalent of Memory.forward: logits = inputs @ mem.T.

    alpha = 0.5 * epoch / 60 only scales the EMA memory update performed in
    MemoryLayer.backward; the forward output does not depend on it.
    """
    # TODO(synk): the in-place EMA memory update + renorm lives in
    # MemoryLayer.backward (training-time state mutation), not in forward.
    del targets, epoch

    b, f = inputs.shape
    c, f2 = mem.shape
    assert f == f2

    # Stream both operands in bf16 (f32 accumulation keeps accuracy); present the
    # memory bank as (F, C) so the contraction is (K, N)-shaped for the MXU.
    x = inputs.astype(compute_dtype)
    w = mem.T.astype(compute_dtype)              # (F, C)

    c_pad = _round_up(c, 128)
    if c_pad != c:
        w = jnp.pad(w, ((0, 0), (0, c_pad - c)))

    x_bytes = jnp.dtype(x.dtype).itemsize
    w_bytes = jnp.dtype(w.dtype).itemsize

    # Size the class tile from the device's VMEM (v7x has half of v5e/v6e).
    try:
        vmem_cap = int(pltpu.get_tpu_info().vmem_capacity_bytes)
    except Exception:
        vmem_cap = 64 * 1024 * 1024
    budget = vmem_cap // 2

    tc = _pick_class_tile(c_pad, b, f, w_bytes, x_bytes, budget)
    grid = (c_pad // tc,)

    tile_bytes = 2 * b * f * x_bytes + 2 * f * tc * w_bytes + 2 * b * tc * 4
    vmem_limit = int(min(vmem_cap, max(tile_bytes + (4 << 20), 16 << 20)))

    cost = pl.CostEstimate(
        flops=2 * b * c_pad * f,
        transcendentals=0,
        bytes_accessed=b * f * x_bytes + c_pad * f * w_bytes + b * c_pad * 4,
    )

    # NOTE: for very large F, add a K ("arbitrary", last) grid axis with an f32
    # VMEM accumulator so the class tile can stay large; unnecessary at small F.
    out = pl.pallas_call(
        memory_logits_kernel,
        out_shape=jax.ShapeDtypeStruct((b, c_pad), jnp.float32),
        grid=grid,
        in_specs=[
            pl.BlockSpec((b, f), lambda j: (0, 0)),    # full inputs each step
            pl.BlockSpec((f, tc), lambda j: (0, j)),   # class slab j of mem.T
        ],
        out_specs=pl.BlockSpec((b, tc), lambda j: (0, j)),
        compiler_params=pltpu.CompilerParams(
            dimension_semantics=("parallel",),
            vmem_limit_bytes=vmem_limit,
        ),
        cost_estimate=cost,
    )(x, w)

    return out[:, :c] if c_pad != c else out


if __name__ == "__main__":
    # Small shapes consistent with the module: batch=8, num_features=128, num_classes=256.
    B, F, C = 8, 128, 256

    key = jax.random.PRNGKey(0)
    k_x, k_m = jax.random.split(key)
    inputs = jax.random.normal(k_x, (B, F), dtype=jnp.float32)
    # PyTorch inits mem to zeros (trivial output); use deterministic random values
    # here so the kernel result is non-trivially checkable.
    mem = jax.random.normal(k_m, (C, F), dtype=jnp.float32)
    targets = jax.random.randint(jax.random.PRNGKey(1), (B,), 0, C)

    logits = jax.block_until_ready(
        memory_forward(inputs, mem, targets=targets, epoch=10)
    )

    assert logits.shape == (B, C)
    assert logits.dtype == jnp.float32

    # Tight check against the same bf16-operand / f32-accumulate reference.
    ref_bf16 = jnp.dot(
        inputs.astype(jnp.bfloat16), mem.T.astype(jnp.bfloat16),
        preferred_element_type=jnp.float32,
    )
    assert jnp.allclose(logits, ref_bf16, atol=1e-3, rtol=1e-3)

    # Sanity check against the full-precision reference (bf16 streaming tolerance).
    ref_f32 = inputs @ mem.T
    assert jnp.allclose(logits, ref_f32, atol=0.5, rtol=5e-2)

    print("KERNEL_OK")
</pallas_src>

<mosaic_0001>
module attributes {stable_mosaic.version = 11 : i64} {
  func.func @memory_logits_kernel(%arg0: i32, %arg1: memref<8x128xbf16, #tpu.memory_space<vmem>>, %arg2: memref<128x128xbf16, #tpu.memory_space<vmem>>, %arg3: memref<8x128xf32, #tpu.memory_space<vmem>>) attributes {dimension_semantics = [#tpu.dimension_semantics<parallel>], iteration_bounds = array<i64: 2>, scalar_prefetch = 0 : i64, scratch_operands = 0 : i64, tpu.core_type = #tpu.core_type<tc>, window_params = [{pipeline_mode = #tpu.pipeline_mode<synchronous>, transform_indices = @transform_0, window_bounds = array<i64: 8, 128>}, {transform_indices = @transform_1, window_bounds = array<i64: 128, 128>}, {transform_indices = @transform_2, window_bounds = array<i64: 8, 128>}]} {
    %c0 = arith.constant 0 : index
    %c0_0 = arith.constant 0 : index
    %0 = vector.load %arg1[%c0, %c0_0] : memref<8x128xbf16, #tpu.memory_space<vmem>>, vector<8x128xbf16>
    %c0_1 = arith.constant 0 : index
    %c0_2 = arith.constant 0 : index
    %1 = vector.load %arg2[%c0_1, %c0_2] : memref<128x128xbf16, #tpu.memory_space<vmem>>, vector<128x128xbf16>
    %cst = arith.constant dense<0.000000e+00> : vector<8x128xf32>
    %2 = tpu.matmul %0, %1, %cst {dimension_numbers = #tpu.dot_dimension_numbers<[1], [0], [0], [1], [0, 0, 1, 1], [], []>} : vector<8x128xbf16>, vector<128x128xbf16>, vector<8x128xf32> -> vector<8x128xf32>
    %c0_3 = arith.constant 0 : index
    %c0_4 = arith.constant 0 : index
    %3 = vector.load %arg3[%c0_3, %c0_4] : memref<8x128xf32, #tpu.memory_space<vmem>>, vector<8x128xf32>
    tpu.vector_store %arg3[%c0_3, %c0_4], %2 {strides = array<i32>} : memref<8x128xf32, #tpu.memory_space<vmem>>, vector<8x128xf32>,
    return
  }
  func.func @transform_0(%arg0: i32) -> (i32, i32) {
    %c0_i32 = arith.constant 0 : i32
    %c0_i32_0 = arith.constant 0 : i32
    %c0_i32_1 = arith.constant 0 : i32
    return %c0_i32, %c0_i32_0 : i32, i32
  }
  func.func @transform_1(%arg0: i32) -> (i32, i32) {
    %c0_i32 = arith.constant 0 : i32
    %c0_i32_0 = arith.constant 0 : i32
    return %c0_i32, %arg0 : i32, i32
  }
  func.func @transform_2(%arg0: i32) -> (i32, i32) {
    %c0_i32 = arith.constant 0 : i32
    %c0_i32_0 = arith.constant 0 : i32
    return %c0_i32, %arg0 : i32, i32
  }
}

</mosaic_0001>

<bundles_post_ra>
// kernel: tpu_custom_call.1
= control target key start
LH: loop header
LB: loop body
LE: loop exit
PB: predicated region body
PF: predicated region fallthrough
CT: control target
= control target key end

     0   :  { %7 = vsyncpa [#allocation3], 0  ;;  %s825_s0 = inlined_call_operand.hbm [shape: bf16[8,128], index: 0, kind: input, shape index: {}]   ;;  %s826_s1 = inlined_call_operand.hbm [shape: bf16[128,256], index: 1, kind: input, shape index: {}]   ;;  %s827_s2 = inlined_call_operand.hbm [shape: f32[8,256], index: 2, kind: output, shape index: {}]  }
   0x1   :  { %8 = vsyncpa [#allocation6], 0 }
   0x2   :  { %10 = vsyncpa [#allocation6 + $0x1], 0 }
   0x3   :  { %11 = vsyncpa [#allocation4], 0 }
   0x4   :  { %13 = vsyncpa [#allocation4 + $0x1], 0  ;;  %s645_s9 = smov 0   ;;  %s647_s10 = smov 0  }
   0x5   :  { %s649_s11 = smov 0   ;;  %s651_s12 = smov 0  }
   0x6 LB: > { %s666_s13 = sadd.s32 4294967295, %s620_s12   ;;  %s377_s14 = sadd.s32 4294967294, %s620_s12   ;;  %s620_s12 = sphi %s651_s12, %s850_s12   ;;  %s616_s11 = sphi %s649_s11, %s849_s11   ;;  %s612_s10 = sphi %s647_s10, %s848_s10   ;;  %s608_s9 = sphi %s645_s9, %s847_s9  }
   0x7   : > { %s670_s15 = sadd.s32 1, %s620_s12   ;;  %s47_s16 = sadd.s32 1, %s616_s11 }
   0x8   : > { %s44_s17 = ssub.s32 %s620_s12, %s670_s15  ;;  %p54_p0 = scmp.ne.s32.totalorder %s616_s11, %s612_s10 }
   0x9   : > { %p45_p1 = scmp.eq.s32.totalorder %s44_s17, 0  ;;  %p55_p2 = scmp.eq.s32.totalorder %s620_s12, 0 }
   0xa   : > { %p60_p3 = scmp.ne.s32.totalorder %s612_s10, %s608_s9  ;;  %p828_p4 = scmp.eq.s32.totalorder %s666_s13, 0 }
   0xb   : > { %s682_s18 = scalar_select %p45_p1, %s616_s11, %s47_s16  }
   0xc   : > { %p684_p5 = por %p55_p2, %p54_p0  ;;  %p690_p6 = por %p828_p4, %p60_p3 }
   0xd   : > { %p84_p7 = scmp.eq.s32.totalorder %s666_s13, 1  ;;  %p90_p8 = scmp.eq.s32.totalorder %s377_s14, 1 }
   0xe   : > { %s833_s20 = scalar_select %p690_p6, 1, 0 }
   0xf   : > { %p378_p9 = scmp.ge.s32.totalorder %s620_s12, 1  ;;  %p97_p10 = scmp.lt.s32.totalorder %s620_s12, 3 }
  0x10   : > { %p697_p11 = por %p84_p7, %p54_p0  ;;  %p701_p12 = por %p90_p8, %p60_p3 }
  0x11   : > { %p705_p13 = pnand %p378_p9, %p97_p10  ;;  %s622_s24 = smov [#allocation2]  }
  0x12   : > { %s834_s21 = scalar_select %p697_p11, 1, 0 }
  0x13   : > { %s835_s22 = scalar_select %p701_p12, 1, 0 }
  0x14   : > { %s836_s23 = scalar_select %p705_p13, 1, 0 }
  0x15   : > { %p436_p2 = pneg %p705_p13  ;;  %s110_s25 = sshll.u32 %s622_s24, 4  ;;  %s111_s25 = int_to_ptr.vmem [resolvable:$true] %s110_s25 }
  0x16   : > { %p449_p4 = scmp.lt.s32.totalorder %s620_s12, 2  ;;  %p837_p0 = scmp.eq.s32.totalorder %s666_s13, 0 }
  0x17   : > { %s121_s27 = sand.u32 1, %s616_s11   ;;  %s509_s30 = scalar_lea.vmem %s111_s25, 64 }
  0x18   : > { %p715_p7 = pnand %p436_p2, %p837_p0  ;;  %p722_p3 = pnand %p449_p4, %p684_p5 }
  0x19   : > { %s381_s29 = sshll.u32 %s121_s27, 6  ;;  %p510_p9 = scmp.ne.s32.totalorder %s111_s25, %s509_s30 }
  0x1a   : > { %p500_p8 = pneg %p715_p7  ;;  %p517_p12 = scmp.lt.s32.totalorder %s111_s25, %s111_s25 }
  0x1b   : > { %p518_p11 = scmp.lt.s32.totalorder %s509_s30, %s509_s30 }
  0x1c   : > { %p512_p10 = pnand %p510_p9, %p500_p8 }
  0x1d   : > { %p519_p2 = por %p518_p11, %p517_p12 }
  0x1e   : > { %p513_p1 = pneg %p512_p10 }
  0x20   : > { %p520_p0 = pnand %p519_p2, %p513_p1 }
  0x22   : > { %523 = shalt.err (!%p520_p0)
}
  0x23   : > { %439 = dma.hbm_to_vmem [thread:$0]  (!%p715_p7), %s825_s0, 64, %s111_s25, [#allocation3]  }
  0x24   : > { %s382_s5 = sshll.u32 %s620_s12, 6  ;;  %s125_s6 = scalar_lea.vmem [#allocation5], %s381_s29 }
  0x25   : > { %s131_s7 = sshll.u32 %s125_s6, 4  ;;  %s737_s16 = scalar_lea.hbm %s826_s1, %s382_s5  ;;  %s739_s7 = int_to_ptr.vmem [resolvable:$true] %s131_s7 }
  0x26   : > { %s741_s17 = scalar_lea.sflag [#allocation6], %s121_s27  ;;  %s524_s19 = scalar_lea.hbm %s737_s16, 1024 }
  0x27   : > { %p525_p4 = scmp.ne.s32.totalorder %s737_s16, %s524_s19  ;;  %p526_p5 = pneg %p722_p3 }
  0x28   : > { %s529_s26 = scalar_lea.hbm %s826_s1, 2048  ;;  %p530_p1 = scmp.lt.s32.totalorder %s737_s16, %s826_s1 }
  0x29   : > { %p527_p11 = pnand %p526_p5, %p525_p4  ;;  %p531_p7 = scmp.lt.s32.totalorder %s529_s26, %s524_s19 }
  0x2b   : > { %p528_p12 = pneg %p527_p11  ;;  %p532_p8 = por %p531_p7, %p530_p1 }
  0x2d   : > { %p533_p9 = pnand %p532_p8, %p528_p12 }
  0x2f   : > { %536 = shalt.err (!%p533_p9)
}
  0x30   : > { %s537_s27 = scalar_lea.vmem %s739_s7, 1024  ;;  %s623_s3 = smov [#allocation5]  }
  0x31   : > { %p538_p10 = scmp.ne.s32.totalorder %s739_s7, %s537_s27  ;;  %s542_s4 = sshll.u32 %s623_s3, 4  ;;  %s543_s4 = int_to_ptr.vmem [resolvable:$false] %s542_s4 }
  0x32   : > { %s544_s5 = scalar_lea.vmem %s543_s4, 2048  ;;  %p545_p4 = scmp.lt.s32.totalorder %s739_s7, %s543_s4 }
  0x33   : > { %p540_p2 = pnand %p538_p10, %p526_p5  ;;  %p546_p11 = scmp.lt.s32.totalorder %s544_s5, %s537_s27 }
  0x35   : > { %p541_p0 = pneg %p540_p2  ;;  %p547_p6 = por %p546_p11, %p545_p4 }
  0x37   : > { %p548_p13 = pnand %p547_p6, %p541_p0 }
  0x39   : > { %551 = shalt.err (!%p548_p13)
}
  0x3a   : > { %s624_s6 = smov 128   ;;  %s625_s8 = smov 64  }
  0x3b   : > { %s626_s14 = smov 4   ;;  %p840_p5 = scmp.ne.s32.totalorder %s836_s23, 0 }
  0x3c   : > { %443 = dma.hbm_to_vmem [thread:$0]  (!%p722_p3), %s737_s16, 1024, %s739_s7, %s741_s17, %s624_s6, %s625_s8, %s626_s14  }
  0x3d   : > { %143 = sbr.rel (%p840_p5) target bundleno = 313 (0x139), region = 28  ;;  %p841_p12 = scmp.eq.s32.totalorder (!%p840_p5), %s666_s13, 0 }
  0x42   : > { %595 = dma.done.wait (%p841_p12), [#allocation3], 64   ;;  %p842_p1 = pmov %p841_p12 }
  0x43   : > { %s769_s19 = sand.u32 1, %s612_s10   ;;  %p843_p6 = scmp.ne.s32.totalorder %s833_s20, 0 }
  0x44   : > { %597 = vsyncadd (%p842_p1), [#allocation3], 4294967232  ;;  %s385_s24 = sshll.u32 %s769_s19, 6  ;;  %s150_s25 = scalar_lea.sflag [#allocation6], %s769_s19 }
  0x45   : > { %s153_s26 = scalar_lea.vmem [#allocation5], %s385_s24 }
  0x46   : > { %599 = dma.done.wait (%p843_p6), %s150_s25, 1024  }
  0x47   : > { %601 = vsyncadd (%p843_p6), %s150_s25, 4294966272  ;;  %v627_v0 = vmov 0.0   ;;  %vm628_vm0 = vmmov 0   ;;  %v490_v1 = vld [vmem:[%s153_s26 + $0x38] sm:$0xff]   ;;  %v491_v2 = vld [vmem:[%s153_s26 + $0x30] sm:$0xff]   ;;  %s386_s20 = sshll.u32 %s769_s19, 3 }
  0x48   : > { %408 = vmatprep.subr.bf16.mxu0 %v627_v0  ;;  %424 = vmatprep.mubr.msk.bf16.mxu0 %vm628_vm0, %v627_v0  ;;  %v492_v3 = vld [vmem:[%s153_s26 + $0x28] sm:$0xff]   ;;  %v493_v4 = vld [vmem:[%s153_s26 + $0x20] sm:$0xff]   ;;  %v494_v5 = vld [vmem:[%s153_s26 + $0x18] sm:$0xff]   ;;  %s173_s23 = scalar_lea.vmem [#allocation7], %s386_s20  ;;  %s396_s7 = sshll.u32 %s666_s13, 7 }
  0x49   : > { %409 = vmatpush3.bf16.msra.mxu0 %v490_v1  ;;  %v495_v6 = vld [vmem:[%s153_s26 + $0x10] sm:$0xff]   ;;  %v496_v7 = vld [vmem:[%s153_s26 + $0x8] sm:$0xff]   ;;  %v497_v8 = vld [vmem:[%s153_s26] sm:$0xff]   ;;  %s295_s28 = sshll.u32 %s173_s23, 4  ;;  %s784_s29 = scalar_lea.hbm %s827_s2, %s396_s7  ;;  %s779_s28 = int_to_ptr.vmem [resolvable:$true] %s295_s28 }
  0x4a   : > { %410 = vmatprep.subr.bf16.mxu0 %v627_v0  ;;  %v175_v9 = vld [vmem:[#allocation2] sm:$0xf]  ;;  %s282_s30 = scalar_lea.sflag [#allocation4], %s769_s19  ;;  %s552_s27 = scalar_lea.vmem %s779_s28, 128 }
  0x4b   : > { %p553_p13 = scmp.ne.s32.totalorder %s779_s28, %s552_s27  ;;  %p844_p3 = scmp.ne.s32.totalorder %s834_s21, 0 }
  0x4c   : > { %s629_s13 = smov [#allocation7]  }
  0x4d   : > { %411 = vmatpush3.bf16.msra.mxu0 %v491_v2  ;;  %p554_p7 = pnand %p553_p13, %p844_p3  ;;  %s556_s3 = sshll.u32 %s629_s13, 4  ;;  %s557_s3 = int_to_ptr.vmem [resolvable:$false] %s556_s3 }
  0x4e   : > { %412 = vmatprep.subr.bf16.mxu0 %v627_v0  ;;  %s558_s4 = scalar_lea.vmem %s557_s3, 256  ;;  %p559_p9 = scmp.lt.s32.totalorder %s779_s28, %s557_s3 }
  0x4f   : > { %p555_p8 = pneg %p554_p7  ;;  %p560_p10 = scmp.lt.s32.totalorder %s558_s4, %s552_s27 }
  0x51   : > { %413 = vmatpush3.bf16.msra.mxu0 %v492_v3  ;;  %p561_p2 = por %p560_p10, %p559_p9 }
  0x52   : > { %414 = vmatprep.subr.bf16.mxu0 %v627_v0 }
  0x53   : > { %p562_p0 = pnand %p561_p2, %p555_p8 }
  0x55   : > { %415 = vmatpush3.bf16.msra.mxu0 %v493_v4 }
  0x56   : > { %416 = vmatprep.subr.bf16.mxu0 %v627_v0 }
  0x59   : > { %417 = vmatpush3.bf16.msra.mxu0 %v494_v5 }
  0x5a   : > { %418 = vmatprep.subr.bf16.mxu0 %v627_v0 }
  0x5d   : > { %419 = vmatpush3.bf16.msra.mxu0 %v495_v6 }
  0x5e   : > { %420 = vmatprep.subr.bf16.mxu0 %v627_v0 }
  0x61   : > { %421 = vmatpush3.bf16.msra.mxu0 %v496_v7 }
  0x62   : > { %422 = vmatprep.subr.bf16.mxu0 %v627_v0 }
  0x65   : > { %423 = vmatpush3.bf16.msra.mxu0 %v497_v8 }
  0x68   : > { %425 = vmatmul.mubr.bf16.vlgmr.msra.gmra.mxu0 %v175_v9 }
 0x128   : > { %v274_v10 = vpop.f32.mrf.mxu0 }
 0x129   : > { %280 = vst [vmem:[%s173_s23] sm:$0xff] %v274_v10 }
 0x12a   : > { %v426_v11 = vpop.f32.mrf.mxu0 }
 0x12b   : > { %565 = shalt.err (!%p562_p0)
}
 0x12c   : > { %s566_s5 = scalar_lea.hbm %s784_s29, 128  ;;  %s570_s14 = scalar_lea.hbm %s827_s2, 256 }
 0x12d   : > { %p567_p4 = scmp.ne.s32.totalorder %s784_s29, %s566_s5  ;;  %p571_p12 = scmp.lt.s32.totalorder %s784_s29, %s827_s2 }
 0x12e   : > { %p572_p1 = scmp.lt.s32.totalorder %s570_s14, %s566_s5 }
 0x12f   : > { %p568_p11 = pnand %p567_p4, %p844_p3 }
 0x130   : > { %p573_p6 = por %p572_p1, %p571_p12 }
 0x131   : > { %p569_p5 = pneg %p568_p11 }
 0x133   : > { %p574_p13 = pnand %p573_p6, %p569_p5 }
 0x135   : > { %577 = shalt.err (!%p574_p13)
}
 0x136   : > { %434 = dma.vmem_to_hbm [thread:$0]  (%p844_p3), %s779_s28, 128, %s784_s29, %s282_s30   ;;  %v277_v12 = vpop.f32.mrf.mxu0 }
 0x138   : > { %v427_v13 = vpop.f32.mrf.mxu0 }
 0x139 PF: > { %s307_s25 = sand.u32 1, %s608_s9   ;;  %p845_p7 = scmp.ne.s32.totalorder %s835_s22, 0 }
 0x13a   : > { %p846_p8 = scmp.ge.s32.totalorder %s620_s12, 2  ;;  %s308_s26 = scalar_lea.sflag [#allocation4], %s307_s25 }
 0x13c   : > { %p445_p9 = pnand %p846_p8, %p845_p7 }
 0x13e   : > { %p446_p10 = pneg %p445_p9 }
 0x140   : > { %603 = dma.done.wait (%p446_p10), %s308_s26, 128  }
 0x141   : > { %605 = vsyncadd (%p446_p10), %s308_s26, 4294967168  ;;  %p16_p3 = scmp.ge.s32.totalorder %s670_s15, 4   ;;  %s847_s9 = smov %s612_s10 }
 0x142   : > { %s848_s10 = smov %s616_s11  ;;  %s849_s11 = smov %s682_s18 }
 0x143   : > { %s850_s12 = smov %s670_s15  ;;  %18 = sbr.rel (!%p16_p3) target bundleno = 6 (0x6), region = 78 }
 0x148   :  { %313 = vsyncpa [#allocation3], 1 }
 0x149   :  { %315 = vsyncpa [#allocation3 + $0x1], 1 }
 0x14a   :  { %316 = vsyncpa [#allocation6], 1 }
 0x14b   :  { %318 = vsyncpa [#allocation6 + $0x1], 1 }
 0x14c   :  { %319 = vsyncpa [#allocation4], 1 }
 0x14d   :  { %321 = vsyncpa [#allocation4 + $0x1], 1 }

</bundles_post_ra>
